<compile_context>
chip_gen: v7x
topology: tpu7x:2x2x1
jax: 0.10.0
libtpu: 0.0.40
codegen_flags: <defaults>
</compile_context>

<pallas_src>
import functools

import jax
import jax.numpy as jnp
from jax.experimental import pallas as pl
from jax.experimental.pallas import tpu as pltpu


def _round_up(x, m):
    return ((x + m - 1) // m) * m


def _prism_kernel(nc_ref, feat_ref, labels_ref, out_ref, *, clear_prob_margin):
    # nc_ref:     (C, F)       f32/bf16  scale-folded, L2-normalized centers (resident)
    # feat_ref:   (TILE_N, F)  f32/bf16  feature tile
    # labels_ref: (1, TILE_N)  i32       lane-dense labels
    # out_ref:    (1, TILE_N)  i32       lane-dense fixed labels
    feats = feat_ref[...]

    # (C, TILE_N): class axis on sublanes, samples lane-dense. RHS contracts on
    # dim 1 so Mosaic feeds the MXU without an explicit transpose/copy.
    logits = jax.lax.dot_general(
        nc_ref[...], feats, (((1,), (1,)), ((), ())),
        preferred_element_type=jnp.float32)

    m = jnp.max(logits, axis=0, keepdims=True)            # (1, TILE_N)
    e = jnp.exp(logits - m)                                # (C, TILE_N)
    denom = jnp.sum(e, axis=0, keepdims=True)              # (1, TILE_N)

    labels = labels_ref[...]                                # (1, TILE_N) int32
    class_ids = jax.lax.broadcasted_iota(jnp.int32, e.shape, 0)
    num = jnp.sum(jnp.where(class_ids == labels, e, 0.0),
                  axis=0, keepdims=True)                    # (1, TILE_N)

    # clear_prob > margin  <=>  num > margin * denom   (denom > 0 always),
    # so no (N, C) divide and no per-sample reciprocal is needed.
    # Note: labels >= C (out of range) yield num == 0 -> output -1, whereas the
    # PyTorch reference would index out of bounds.
    keep = (labels >= 0) & (num > jnp.float32(clear_prob_margin) * denom)
    out_ref[...] = jnp.where(keep, labels, jnp.int32(-1))


def _vmem_budget_bytes():
    """Generation-aware (budget_for_tiling, vmem_limit) in bytes.

    v5e/v6e (128 MiB physical) -> ~104 MiB budget / 112 MiB scoped limit.
    v7x     ( 64 MiB per TC)   -> ~ 40 MiB budget /  48 MiB scoped limit.
    """
    try:
        cap = int(pltpu.get_tpu_info().vmem_capacity_bytes)
    except Exception:  # pragma: no cover - conservative fallback
        cap = 64 * 1024 * 1024
    limit = min(cap - 16 * 1024 * 1024, int(cap * 0.875))
    limit = max(limit, 32 * 1024 * 1024)
    budget = max(limit - 8 * 1024 * 1024, 24 * 1024 * 1024)
    return budget, limit


def _pick_tile_n(n, c, f, feat_itemsize, budget_bytes):
    """Largest lane-aligned TILE_N whose working set fits the VMEM budget."""
    n_ceil = _round_up(max(n, 1), 128)

    # Per-tile working set:
    #   features tile (double-buffered)     : 2 * t * f * feat_itemsize
    #   labels + out tiles (double-buffered): 2 * (t*4) * 2 = 16 * t
    #   (C, t) f32 intermediates (logits/e/select): ~12 * c * t
    # Resident centers (pessimistically counted double-buffered in case the
    # single-buffer request falls back): 2 * c * f * feat_itemsize.
    centers_bytes = 2 * c * f * feat_itemsize
    per_row = 2 * f * feat_itemsize + 16 + 12 * c
    avail = budget_bytes - centers_bytes
    t_max = max(avail // per_row, 128) if avail > 0 else 128

    tile = max(128, min((t_max // 128) * 128, n_ceil))

    # Avoid materializing a padded HBM copy of the features: prefer a
    # lane-aligned tile that divides N exactly when one exists.
    if n >= 128 and n % 128 == 0 and n % tile != 0:
        d = tile
        while n % d != 0:
            d -= 128
        tile = d

    # v7x megacore: make sure there are >= 2 "parallel" grid steps when the
    # tile can be split without changing divisibility (no-op on v5e/v6e).
    if _round_up(max(n, 1), tile) // tile < 2 and tile % 256 == 0:
        tile //= 2

    return tile


def prism_forward(feature_buffer, features, labels, *, enable_cleaning=True,
                  scale=10.0, clear_prob_margin=0.5, matmul_dtype=jnp.bfloat16):
    """Pallas implementation of PRISM.forward (returns fixed_labels).

    matmul_dtype defaults to bfloat16 (halves the feature HBM stream; f32 MXU
    accumulation). Pass jnp.float32 for bit-parity with the PyTorch reference.
    """
    C, _, F = feature_buffer.shape
    labels_flat = labels.reshape(-1).astype(jnp.int32)

    if not enable_cleaning:
        # Same as PyTorch path: all valid labels kept, negatives stay -1.
        return jnp.where(labels_flat >= 0, labels_flat, jnp.int32(-1))

    matmul_dtype = jnp.dtype(matmul_dtype)

    # Single cast to the streaming dtype, BEFORE any padding (no f32 round-trip).
    feats = features.reshape(-1, F)
    if feats.dtype != matmul_dtype:
        feats = feats.astype(matmul_dtype)
    N = feats.shape[0]

    # Hoisted center computation (mean over buffer + L2-normalize) with the
    # softmax temperature folded into the centers, done once in plain XLA.
    centers = jnp.mean(feature_buffer.astype(jnp.float32), axis=1)       # (C, F)
    norm = jnp.sqrt(jnp.sum(centers * centers, axis=1, keepdims=True))
    norm_centers = (centers * (jnp.float32(scale) / jnp.maximum(norm, 1e-12))
                    ).astype(matmul_dtype)

    budget_bytes, vmem_limit = _vmem_budget_bytes()
    tile = _pick_tile_n(N, C, F, matmul_dtype.itemsize, budget_bytes)
    n_pad = _round_up(max(N, 1), tile)

    if n_pad == N:
        # No padded copy of the dominant feature stream.
        feats_p = feats
        labels_p = labels_flat.reshape(1, N)
    else:
        # Padded rows carry label -1 and produce -1 regardless of features.
        feats_p = jnp.zeros((n_pad, F), matmul_dtype).at[:N].set(feats)
        labels_p = jnp.full((1, n_pad), -1, jnp.int32).at[0, :N].set(labels_flat)

    kernel = functools.partial(_prism_kernel,
                               clear_prob_margin=float(clear_prob_margin))

    def run(centers_spec):
        return pl.pallas_call(
            kernel,
            out_shape=jax.ShapeDtypeStruct((1, n_pad), jnp.int32),
            grid=(n_pad // tile,),
            in_specs=[
                centers_spec,                                 # centers: resident
                pl.BlockSpec((tile, F), lambda i: (i, 0)),    # feature tile
                pl.BlockSpec((1, tile), lambda i: (0, i)),    # labels, lane-dense
            ],
            out_specs=pl.BlockSpec((1, tile), lambda i: (0, i)),
            compiler_params=pltpu.CompilerParams(
                dimension_semantics=("parallel",),
                vmem_limit_bytes=vmem_limit,
            ),
        )(norm_centers, feats_p, labels_p)

    try:
        # Centers block index never changes: request single buffering to save
        # C*F*itemsize of VMEM (matters most on v7x's 64 MiB per-TC VMEM).
        out = run(pl.BlockSpec((C, F), lambda i: (0, 0),
                               pipeline_mode=pl.Buffered(1)))
    except Exception:
        # Older / stricter JAX versions: fall back to default double-buffering.
        out = run(pl.BlockSpec((C, F), lambda i: (0, 0)))

    return out[0, :N]


def _prism_reference(feature_buffer, features, labels, *,
                     scale=10.0, clear_prob_margin=0.5):
    centers = jnp.mean(feature_buffer, axis=1)
    norm_centers = centers / jnp.maximum(
        jnp.linalg.norm(centers, axis=1, keepdims=True), 1e-12)
    sim = norm_centers @ features.T                            # (C, N)
    probs = jax.nn.softmax(scale * sim, axis=0)
    clear_prob = probs[labels.clip(0), jnp.arange(labels.shape[0])]
    keep = (labels >= 0) & (clear_prob > clear_prob_margin)
    return jnp.where(keep, labels, -1).astype(jnp.int32)


if __name__ == "__main__":
    # Small synthetic setup consistent with PRISM(__init__):
    num_classes, feature_length, buffer_size, batch = 8, 128, 4, 16

    key = jax.random.PRNGKey(0)
    k_buf, k_feat, k_lab = jax.random.split(key, 3)

    # Deterministic "state": buffer already populated, cleaning enabled.
    feature_buffer = jax.random.normal(
        k_buf, (num_classes, buffer_size, feature_length), dtype=jnp.float32)
    features = jax.random.normal(
        k_feat, (batch, feature_length), dtype=jnp.float32)
    labels = jax.random.randint(k_lab, (batch,), -1, num_classes, dtype=jnp.int32)

    # f32 path: bit-parity validation against the pure-JAX reference.
    fixed = prism_forward(feature_buffer, features, labels,
                          enable_cleaning=True, scale=10.0,
                          clear_prob_margin=0.5, matmul_dtype=jnp.float32)
    fixed = jax.block_until_ready(fixed)
    ref = _prism_reference(feature_buffer, features, labels,
                           scale=10.0, clear_prob_margin=0.5)
    assert fixed.shape == (batch,) and fixed.dtype == jnp.int32
    assert bool(jnp.all(fixed == ref)), (fixed, ref)

    # Default bf16-stream path: run + sanity checks (margin-borderline samples
    # may legitimately differ from f32 by bf16 rounding, so no exact compare).
    fixed_bf16 = jax.block_until_ready(
        prism_forward(feature_buffer, features, labels,
                      enable_cleaning=True, scale=10.0, clear_prob_margin=0.5))
    assert fixed_bf16.shape == (batch,) and fixed_bf16.dtype == jnp.int32

    # Cleaning-disabled path (pure JAX, matches PyTorch "else" branch).
    fixed_nc = jax.block_until_ready(
        prism_forward(feature_buffer, features, labels, enable_cleaning=False))
    assert bool(jnp.all(fixed_nc == jnp.where(labels >= 0, labels, -1)))

    print("KERNEL_OK")
</pallas_src>

<mosaic_0001>
module attributes {stable_mosaic.version = 11 : i64} {
  func.func @_prism_kernel(%arg0: i32, %arg1: memref<8x128xf32, #tpu.memory_space<vmem>>, %arg2: memref<128x128xf32, #tpu.memory_space<vmem>>, %arg3: memref<1x128xi32, #tpu.memory_space<vmem>>, %arg4: memref<1x128xi32, #tpu.memory_space<vmem>>) attributes {dimension_semantics = [#tpu.dimension_semantics<parallel>], iteration_bounds = array<i64: 1>, scalar_prefetch = 0 : i64, scratch_operands = 0 : i64, tpu.core_type = #tpu.core_type<tc>, window_params = [{pipeline_mode = #tpu.pipeline_mode<synchronous>, transform_indices = @transform_0, window_bounds = array<i64: 8, 128>}, {transform_indices = @transform_1, window_bounds = array<i64: 128, 128>}, {transform_indices = @transform_2, window_bounds = array<i64: 1, 128>}, {transform_indices = @transform_3, window_bounds = array<i64: 1, 128>}]} {
    %c0 = arith.constant 0 : index
    %c0_0 = arith.constant 0 : index
    %0 = vector.load %arg2[%c0, %c0_0] : memref<128x128xf32, #tpu.memory_space<vmem>>, vector<128x128xf32>
    %c0_1 = arith.constant 0 : index
    %c0_2 = arith.constant 0 : index
    %1 = vector.load %arg1[%c0_1, %c0_2] : memref<8x128xf32, #tpu.memory_space<vmem>>, vector<8x128xf32>
    %cst = arith.constant dense<0.000000e+00> : vector<8x128xf32>
    %2 = tpu.matmul %1, %0, %cst {dimension_numbers = #tpu.dot_dimension_numbers<[1], [1], [0], [0], [0, 0, 1, 0], [], []>} : vector<8x128xf32>, vector<128x128xf32>, vector<8x128xf32> -> vector<8x128xf32>
    %cst_3 = arith.constant dense<0xFF800000> : vector<128xf32>
    %3 = vector.multi_reduction <maximumf>, %2, %cst_3 [0] : vector<8x128xf32> to vector<128xf32>
    %4 = vector.shape_cast %3 : vector<128xf32> to vector<1x128xf32>
    %5 = vector.broadcast %4 : vector<1x128xf32> to vector<8x128xf32>
    %6 = arith.subf %2, %5 : vector<8x128xf32>
    %7 = math.exp %6 : vector<8x128xf32>
    %cst_4 = arith.constant dense<0.000000e+00> : vector<128xf32>
    %8 = vector.multi_reduction <add>, %7, %cst_4 [0] : vector<8x128xf32> to vector<128xf32>
    %9 = vector.shape_cast %8 : vector<128xf32> to vector<1x128xf32>
    %c0_5 = arith.constant 0 : index
    %c0_6 = arith.constant 0 : index
    %10 = vector.load %arg3[%c0_5, %c0_6] : memref<1x128xi32, #tpu.memory_space<vmem>>, vector<1x128xi32>
    %11 = tpu.iota {dimensions = array<i32: 0>} : vector<8x128xi32>
    %12 = vector.broadcast %10 : vector<1x128xi32> to vector<8x128xi32>
    %13 = arith.cmpi eq, %11, %12 : vector<8x128xi32>
    %cst_7 = arith.constant 0.000000e+00 : f32
    %14 = vector.broadcast %cst_7 : f32 to vector<8x128xf32>
    %15 = arith.select %13, %7, %14 : vector<8x128xi1>, vector<8x128xf32>
    %cst_8 = arith.constant dense<0.000000e+00> : vector<128xf32>
    %16 = vector.multi_reduction <add>, %15, %cst_8 [0] : vector<8x128xf32> to vector<128xf32>
    %17 = vector.shape_cast %16 : vector<128xf32> to vector<1x128xf32>
    %c0_i32 = arith.constant 0 : i32
    %18 = vector.broadcast %c0_i32 : i32 to vector<1x128xi32>
    %19 = arith.cmpi sge, %10, %18 : vector<1x128xi32>
    %cst_9 = arith.constant 5.000000e-01 : f32
    %20 = vector.broadcast %cst_9 : f32 to vector<1x128xf32>
    %21 = arith.mulf %20, %9 : vector<1x128xf32>
    %22 = arith.cmpf ogt, %17, %21 : vector<1x128xf32>
    %23 = arith.andi %19, %22 : vector<1x128xi1>
    %c-1_i32 = arith.constant -1 : i32
    %24 = vector.broadcast %c-1_i32 : i32 to vector<1x128xi32>
    %25 = arith.select %23, %10, %24 : vector<1x128xi1>, vector<1x128xi32>
    %c0_10 = arith.constant 0 : index
    %c0_11 = arith.constant 0 : index
    %26 = vector.load %arg4[%c0_10, %c0_11] : memref<1x128xi32, #tpu.memory_space<vmem>>, vector<1x128xi32>
    tpu.vector_store %arg4[%c0_10, %c0_11], %25 {strides = array<i32>} : memref<1x128xi32, #tpu.memory_space<vmem>>, vector<1x128xi32>,
    return
  }
  func.func @transform_0(%arg0: i32) -> (i32, i32) {
    %c0_i32 = arith.constant 0 : i32
    %c0_i32_0 = arith.constant 0 : i32
    %c0_i32_1 = arith.constant 0 : i32
    return %c0_i32, %c0_i32_0 : i32, i32
  }
  func.func @transform_1(%arg0: i32) -> (i32, i32) {
    %c0_i32 = arith.constant 0 : i32
    %c0_i32_0 = arith.constant 0 : i32
    return %arg0, %c0_i32 : i32, i32
  }
  func.func @transform_2(%arg0: i32) -> (i32, i32) {
    %c0_i32 = arith.constant 0 : i32
    %c0_i32_0 = arith.constant 0 : i32
    return %c0_i32, %arg0 : i32, i32
  }
  func.func @transform_3(%arg0: i32) -> (i32, i32) {
    %c0_i32 = arith.constant 0 : i32
    %c0_i32_0 = arith.constant 0 : i32
    return %c0_i32, %arg0 : i32, i32
  }
}

module attributes {stable_mosaic.version = 11 : i64} {
  func.func @_prism_kernel(%arg0: i32, %arg1: memref<8x128xf32, #tpu.memory_space<vmem>>, %arg2: memref<128x128xf32, #tpu.memory_space<vmem>>, %arg3: memref<1x128xi32, #tpu.memory_space<vmem>>, %arg4: memref<1x128xi32, #tpu.memory_space<vmem>>) attributes {dimension_semantics = [#tpu.dimension_semantics<parallel>], iteration_bounds = array<i64: 1>, scalar_prefetch = 0 : i64, scratch_operands = 0 : i64, tpu.core_type = #tpu.core_type<tc>, window_params = [{pipeline_mode = #tpu.pipeline_mode<synchronous>, transform_indices = @transform_0, window_bounds = array<i64: 8, 128>}, {transform_indices = @transform_1, window_bounds = array<i64: 128, 128>}, {transform_indices = @transform_2, window_bounds = array<i64: 1, 128>}, {transform_indices = @transform_3, window_bounds = array<i64: 1, 128>}]} {
    %c0 = arith.constant 0 : index
    %c0_0 = arith.constant 0 : index
    %0 = vector.load %arg2[%c0, %c0_0] : memref<128x128xf32, #tpu.memory_space<vmem>>, vector<128x128xf32>
    %c0_1 = arith.constant 0 : index
    %c0_2 = arith.constant 0 : index
    %1 = vector.load %arg1[%c0_1, %c0_2] : memref<8x128xf32, #tpu.memory_space<vmem>>, vector<8x128xf32>
    %cst = arith.constant dense<0.000000e+00> : vector<8x128xf32>
    %2 = tpu.matmul %1, %0, %cst {dimension_numbers = #tpu.dot_dimension_numbers<[1], [1], [0], [0], [0, 0, 1, 0], [], []>} : vector<8x128xf32>, vector<128x128xf32>, vector<8x128xf32> -> vector<8x128xf32>
    %cst_3 = arith.constant dense<0xFF800000> : vector<128xf32>
    %3 = vector.multi_reduction <maximumf>, %2, %cst_3 [0] : vector<8x128xf32> to vector<128xf32>
    %4 = vector.shape_cast %3 : vector<128xf32> to vector<1x128xf32>
    %5 = vector.broadcast %4 : vector<1x128xf32> to vector<8x128xf32>
    %6 = arith.subf %2, %5 : vector<8x128xf32>
    %7 = math.exp %6 : vector<8x128xf32>
    %cst_4 = arith.constant dense<0.000000e+00> : vector<128xf32>
    %8 = vector.multi_reduction <add>, %7, %cst_4 [0] : vector<8x128xf32> to vector<128xf32>
    %9 = vector.shape_cast %8 : vector<128xf32> to vector<1x128xf32>
    %c0_5 = arith.constant 0 : index
    %c0_6 = arith.constant 0 : index
    %10 = vector.load %arg3[%c0_5, %c0_6] : memref<1x128xi32, #tpu.memory_space<vmem>>, vector<1x128xi32>
    %11 = tpu.iota {dimensions = array<i32: 0>} : vector<8x128xi32>
    %12 = vector.broadcast %10 : vector<1x128xi32> to vector<8x128xi32>
    %13 = arith.cmpi eq, %11, %12 : vector<8x128xi32>
    %cst_7 = arith.constant 0.000000e+00 : f32
    %14 = vector.broadcast %cst_7 : f32 to vector<8x128xf32>
    %15 = arith.select %13, %7, %14 : vector<8x128xi1>, vector<8x128xf32>
    %cst_8 = arith.constant dense<0.000000e+00> : vector<128xf32>
    %16 = vector.multi_reduction <add>, %15, %cst_8 [0] : vector<8x128xf32> to vector<128xf32>
    %17 = vector.shape_cast %16 : vector<128xf32> to vector<1x128xf32>
    %c0_i32 = arith.constant 0 : i32
    %18 = vector.broadcast %c0_i32 : i32 to vector<1x128xi32>
    %19 = arith.cmpi sge, %10, %18 : vector<1x128xi32>
    %cst_9 = arith.constant 5.000000e-01 : f32
    %20 = vector.broadcast %cst_9 : f32 to vector<1x128xf32>
    %21 = arith.mulf %20, %9 : vector<1x128xf32>
    %22 = arith.cmpf ogt, %17, %21 : vector<1x128xf32>
    %23 = arith.andi %19, %22 : vector<1x128xi1>
    %c-1_i32 = arith.constant -1 : i32
    %24 = vector.broadcast %c-1_i32 : i32 to vector<1x128xi32>
    %25 = arith.select %23, %10, %24 : vector<1x128xi1>, vector<1x128xi32>
    %c0_10 = arith.constant 0 : index
    %c0_11 = arith.constant 0 : index
    %26 = vector.load %arg4[%c0_10, %c0_11] : memref<1x128xi32, #tpu.memory_space<vmem>>, vector<1x128xi32>
    tpu.vector_store %arg4[%c0_10, %c0_11], %25 {strides = array<i32>} : memref<1x128xi32, #tpu.memory_space<vmem>>, vector<1x128xi32>,
    return
  }
  func.func @transform_0(%arg0: i32) -> (i32, i32) {
    %c0_i32 = arith.constant 0 : i32
    %c0_i32_0 = arith.constant 0 : i32
    %c0_i32_1 = arith.constant 0 : i32
    return %c0_i32, %c0_i32_0 : i32, i32
  }
  func.func @transform_1(%arg0: i32) -> (i32, i32) {
    %c0_i32 = arith.constant 0 : i32
    %c0_i32_0 = arith.constant 0 : i32
    return %arg0, %c0_i32 : i32, i32
  }
  func.func @transform_2(%arg0: i32) -> (i32, i32) {
    %c0_i32 = arith.constant 0 : i32
    %c0_i32_0 = arith.constant 0 : i32
    return %c0_i32, %arg0 : i32, i32
  }
  func.func @transform_3(%arg0: i32) -> (i32, i32) {
    %c0_i32 = arith.constant 0 : i32
    %c0_i32_0 = arith.constant 0 : i32
    return %c0_i32, %arg0 : i32, i32
  }
}

</mosaic_0001>

<bundles_post_ra>
// kernel: tpu_custom_call.1
= control target key start
LH: loop header
LB: loop body
LE: loop exit
PB: predicated region body
PF: predicated region fallthrough
CT: control target
= control target key end

     0   :  { %8 = vsyncpa [#allocation3], 0  ;;  %s412_s0 = inlined_call_operand.hbm [shape: f32[8,128], index: 0, kind: input, shape index: {}]   ;;  %s413_s1 = inlined_call_operand.hbm [shape: f32[128,128], index: 1, kind: input, shape index: {}]   ;;  %s414_s2 = inlined_call_operand.vmem [shape: s32[1,128], index: 2, kind: input, shape index: {}]   ;;  %s415_s3 = inlined_call_operand.hbm [shape: s32[1,128], index: 3, kind: output, shape index: {}]  }
   0x1   :  { %9 = vsyncpa [#allocation6], 0 }
   0x2   :  { %10 = vsyncpa [#allocation4], 0  ;;  %s338_s12 = smov [#allocation2]   ;;  %s339_s14 = smov [#allocation5]  }
   0x3   :  { %s17_s13 = sshll.u32 %s338_s12, 4  ;;  %s26_s15 = sshll.u32 %s339_s14, 4  ;;  %s18_s13 = int_to_ptr.vmem [resolvable:$true] %s17_s13  ;;  %s366_s15 = int_to_ptr.vmem [resolvable:$true] %s26_s15 }
   0x4   :  { %s266_s18 = scalar_lea.hbm %s412_s0, 128 }
   0x5   :  { %p267_p0 = scmp.ne.s32.totalorder %s412_s0, %s266_s18  ;;  %p270_p1 = scmp.lt.u32.totalorder %s266_s18, %s412_s0 }
   0x7   :  { %p272_p2 = pnand %p270_p1, %p267_p0 }
   0x9   :  { %275 = shalt.err (!%p272_p2)
}
   0xa   :  { %s276_s23 = scalar_lea.vmem %s18_s13, 128  ;;  %p281_p4 = scmp.lt.s32.totalorder %s18_s13, %s18_s13 }
   0xb   :  { %p277_p3 = scmp.ne.s32.totalorder %s18_s13, %s276_s23  ;;  %p282_p5 = scmp.lt.s32.totalorder %s276_s23, %s276_s23 }
   0xd   :  { %p283_p6 = por %p282_p5, %p281_p4 }
   0xf   :  { %p284_p7 = pnand %p283_p6, %p277_p3 }
  0x11   :  { %287 = shalt.err (!%p284_p7)
}
  0x12   :  { %20 = dma.hbm_to_vmem [thread:$0]  %s412_s0, 128, %s18_s13, [#allocation3]  }
  0x13   :  { %s288_s28 = scalar_lea.hbm %s413_s1, 2048 }
  0x14   :  { %p289_p8 = scmp.ne.s32.totalorder %s413_s1, %s288_s28  ;;  %p292_p9 = scmp.lt.u32.totalorder %s288_s28, %s413_s1 }
  0x16   :  { %p294_p10 = pnand %p292_p9, %p289_p8 }
  0x18   :  { %297 = shalt.err (!%p294_p10)
}
  0x19   :  { %s298_s6 = scalar_lea.vmem %s366_s15, 2048  ;;  %p303_p12 = scmp.lt.s32.totalorder %s366_s15, %s366_s15 }
  0x1a   :  { %p299_p11 = scmp.ne.s32.totalorder %s366_s15, %s298_s6  ;;  %p304_p13 = scmp.lt.s32.totalorder %s298_s6, %s298_s6 }
  0x1c   :  { %p305_p0 = por %p304_p13, %p303_p12 }
  0x1e   :  { %p306_p1 = pnand %p305_p0, %p299_p11 }
  0x20   :  { %309 = shalt.err (!%p306_p1)
}
  0x21   :  { %s340_s0 = smov 128   ;;  %s341_s7 = smov 8  }
  0x22   :  { %32 = dma.hbm_to_vmem [thread:$0]  %s413_s1, 2048, %s366_s15, [#allocation6], %s340_s0, %s340_s0, %s341_s7  }
  0x23   :  { %332 = dma.done.wait [#allocation3], 128  }
  0x24   :  { %333 = vsyncadd [#allocation3], 4294967168 }
  0x25   :  { %334 = dma.done.wait [#allocation6], 2048  }
  0x26   :  { %335 = vsyncadd [#allocation6], 4294965248  ;;  %v342_v0 = vmov 0.0|0.0   ;;  %vm343_vm0 = vmmov 0   ;;  %v344_v1 = vmov 0.0   ;;  %v41_v2 = vld [vmem:[#allocation5] sm:$0xff]  ;;  %v144_v34 = vlaneseq }
  0x27   :  { %232 = vmatprep.subr.bf16.mxu0 %v342_v0  ;;  %229 = vmatprep.mubr.msk.f32.mxu0 %vm343_vm0, %v344_v1  ;;  %v42_v3 = vld [vmem:[#allocation5 + $0x8] sm:$0xff]  ;;  %v43_v5 = vld [vmem:[#allocation5 + $0x10] sm:$0xff]  ;;  %v44_v6 = vld [vmem:[#allocation5 + $0x18] sm:$0xff]  ;;  %s345_s11 = smov [#allocation7]  }
  0x28   :  { %v233_v4 = vpack.c.bf16 %v42_v3, %v41_v2  ;;  %v236_v7 = vpack.c.bf16 %v44_v6, %v43_v5  ;;  %v45_v8 = vld [vmem:[#allocation5 + $0x20] sm:$0xff]  ;;  %v46_v9 = vld [vmem:[#allocation5 + $0x28] sm:$0xff]  ;;  %v47_v11 = vld [vmem:[#allocation5 + $0x30] sm:$0xff]  ;;  %v145_v37 = vshrl.u32 %v144_v34, 7 }
  0x29   :  { %v239_v10 = vpack.c.bf16 %v46_v9, %v45_v8  ;;  %v48_v12 = vld [vmem:[#allocation5 + $0x38] sm:$0xff]  ;;  %v49_v14 = vld [vmem:[#allocation5 + $0x40] sm:$0xff]  ;;  %v50_v15 = vld [vmem:[#allocation5 + $0x48] sm:$0xff] }
  0x2a   :  { %234 = vmatpush3.bf16.xpose.msra.mxu0 %v233_v4  ;;  %v242_v13 = vpack.c.bf16 %v48_v12, %v47_v11  ;;  %v245_v16 = vpack.c.bf16 %v50_v15, %v49_v14  ;;  %v51_v17 = vld [vmem:[#allocation5 + $0x50] sm:$0xff]  ;;  %v52_v18 = vld [vmem:[#allocation5 + $0x58] sm:$0xff]  ;;  %v53_v20 = vld [vmem:[#allocation5 + $0x60] sm:$0xff]  ;;  %v148_v39 = vsub.s32 0, %v145_v37 }
  0x2b   :  { %235 = vmatprep.subr.bf16.mxu0 %v342_v0  ;;  %v248_v19 = vpack.c.bf16 %v52_v18, %v51_v17  ;;  %v54_v21 = vld [vmem:[#allocation5 + $0x68] sm:$0xff]  ;;  %v55_v23 = vld [vmem:[#allocation5 + $0x70] sm:$0xff]  ;;  %v56_v24 = vld [vmem:[#allocation5 + $0x78] sm:$0xff] }
  0x2c   :  { %v251_v22 = vpack.c.bf16 %v54_v21, %v53_v20  ;;  %v254_v25 = vpack.c.bf16 %v56_v24, %v55_v23  ;;  %v57_v26 = vld [vmem:[#allocation2] sm:$0xff] }
  0x2d   :  { %v143_v40 = vld [vmem:[%s414_s2] sm:$0x1]  ;;  %s170_s2 = sshll.u32 %s345_s11, 4  ;;  %s171_s2 = int_to_ptr.vmem [resolvable:$true] %s170_s2 }
  0x2e   :  { %v149_v41 = vrot.slane %v143_v40, %v148_v39  ;;  %vm158_vm2 = vcmp.ge.s32.totalorder %v143_v40, 0  ;;  %s310_s12 = scalar_lea.vmem %s171_s2, 16  ;;  %s314_s13 = scalar_lea.vmem %s171_s2, 32 }
  0x2f   :  { %p311_p2 = scmp.ne.s32.totalorder %s171_s2, %s310_s12  ;;  %p315_p3 = scmp.lt.s32.totalorder %s171_s2, %s171_s2 }
  0x30   :  { %vm150_vm1 = vcmp.eq.s32.totalorder %v145_v37, %v149_v41  ;;  %p316_p4 = scmp.lt.s32.totalorder %s314_s13, %s310_s12 }
  0x32   :  { %237 = vmatpush3.bf16.xpose.msra.mxu0 %v236_v7  ;;  %p317_p5 = por %p316_p4, %p315_p3 }
  0x33   :  { %238 = vmatprep.subr.bf16.mxu0 %v342_v0 }
  0x34   :  { %p318_p6 = pnand %p317_p5, %p311_p2 }
  0x3a   :  { %240 = vmatpush3.bf16.xpose.msra.mxu0 %v239_v10 }
  0x3b   :  { %241 = vmatprep.subr.bf16.mxu0 %v342_v0 }
  0x42   :  { %243 = vmatpush3.bf16.xpose.msra.mxu0 %v242_v13 }
  0x43   :  { %244 = vmatprep.subr.bf16.mxu0 %v342_v0 }
  0x4a   :  { %246 = vmatpush3.bf16.xpose.msra.mxu0 %v245_v16 }
  0x4b   :  { %247 = vmatprep.subr.bf16.mxu0 %v342_v0 }
  0x52   :  { %249 = vmatpush3.bf16.xpose.msra.mxu0 %v248_v19 }
  0x53   :  { %250 = vmatprep.subr.bf16.mxu0 %v342_v0 }
  0x5a   :  { %252 = vmatpush3.bf16.xpose.msra.mxu0 %v251_v22 }
  0x5b   :  { %253 = vmatprep.subr.bf16.mxu0 %v342_v0 }
  0x62   :  { %255 = vmatpush3.bf16.xpose.msra.mxu0 %v254_v25 }
  0x69   :  { %230 = vmatmul.mubr.f32.vlgmr.msra.gmra.mrb[0].mxu0 %v57_v26 }
 0x13c   :  { %v124_v27 = vpop.f32.mrb[0].mxu0 }
 0x13d   :  { %v128_v28 = vrot.slane %v124_v27, 4  ;;  %v231_v29 = vpop.f32.mrb[1].mxu0 }
 0x13f   :  { %v129_v30 = vmax.f32 %v124_v27, %v128_v28 }
 0x141   :  { %v130_v31 = vrot.slane %v129_v30, 2 }
 0x143   :  { %v131_v32 = vmax.f32 %v129_v30, %v130_v31 }
 0x145   :  { %v132_v33 = vrot.slane %v131_v32, 1 }
 0x147   :  { %v133_v35 = vmax.f32 %v131_v32, %v132_v33 }
 0x149   :  { %v134_v36 = vsub.f32 %v124_v27, %v133_v35 }
 0x14b   :  { %v135_v38 = vmul.f32 1.442695, %v134_v36 }
 0x14d   :  { %264 = vpow2.f32 %v135_v38 }
 0x157   :  { %v265_v42 = vpop.eup %264 }
 0x158   :  { %v137_v43 = vrot.slane %v265_v42, 4  ;;  %v151_v44 = vsel %vm150_vm1, %v265_v42, 0.0 }
 0x159   :  { %v152_v45 = vrot.slane %v151_v44, 4 }
 0x15a   :  { %v138_v46 = vadd.f32 %v265_v42, %v137_v43 }
 0x15b   :  { %v153_v47 = vadd.f32 %v152_v45, %v151_v44 }
 0x15c   :  { %v139_v48 = vrot.slane %v138_v46, 2 }
 0x15d   :  { %v154_v49 = vrot.slane %v153_v47, 2 }
 0x15e   :  { %v140_v50 = vadd.f32 %v139_v48, %v138_v46 }
 0x15f   :  { %v155_v51 = vadd.f32 %v154_v49, %v153_v47 }
 0x160   :  { %v141_v52 = vrot.slane %v140_v50, 1 }
 0x161   :  { %v156_v53 = vrot.slane %v155_v51, 1 }
 0x162   :  { %v142_v54 = vadd.f32 %v141_v52, %v140_v50 }
 0x163   :  { %v157_v55 = vadd.f32 %v156_v53, %v155_v51 }
 0x164   :  { %v159_v56 = vmul.f32 0.5, %v142_v54 }
 0x166   :  { %vm160_vm3 = vcmp.gt.f32.partialorder %v157_v55, %v159_v56 }
 0x167   :  { %vm161_vm4 = vmand %vm158_vm2, %vm160_vm3 }
 0x168   :  { %v162_v57 = vsel %vm161_vm4, %v143_v40, 4294967295 }
 0x169   :  { %163 = vst [vmem:[#allocation7] sm:$0x1] %v162_v57 }
 0x16a   :  { %321 = shalt.err (!%p318_p6)
}
 0x16b   :  { %s322_s16 = scalar_lea.hbm %s415_s3, 16 }
 0x16c   :  { %p323_p7 = scmp.ne.s32.totalorder %s415_s3, %s322_s16  ;;  %p326_p8 = scmp.lt.u32.totalorder %s322_s16, %s415_s3 }
 0x16e   :  { %p328_p9 = pnand %p326_p8, %p323_p7 }
 0x170   :  { %331 = shalt.err (!%p328_p9)
}
 0x171   :  { %173 = dma.vmem_to_hbm [thread:$0]  %s171_s2, 16, %s415_s3, [#allocation4]  }
 0x172   :  { %336 = dma.done.wait [#allocation4], 16  }
 0x173   :  { %337 = vsyncadd [#allocation4], 4294967280 }
 0x174   :  { %177 = vsyncpa [#allocation3], 1 }
 0x175   :  { %178 = vsyncpa [#allocation6], 1 }
 0x176   :  { %179 = vsyncpa [#allocation4], 1 }

// kernel: tpu_custom_call.1
= control target key start
LH: loop header
LB: loop body
LE: loop exit
PB: predicated region body
PF: predicated region fallthrough
CT: control target
= control target key end

     0   :  { %8 = vsyncpa [#allocation3], 0  ;;  %s412_s0 = inlined_call_operand.hbm [shape: f32[8,128], index: 0, kind: input, shape index: {}]   ;;  %s413_s1 = inlined_call_operand.hbm [shape: f32[128,128], index: 1, kind: input, shape index: {}]   ;;  %s414_s2 = inlined_call_operand.vmem [shape: s32[1,128], index: 2, kind: input, shape index: {}]   ;;  %s415_s3 = inlined_call_operand.hbm [shape: s32[1,128], index: 3, kind: output, shape index: {}]  }
   0x1   :  { %9 = vsyncpa [#allocation6], 0 }
   0x2   :  { %10 = vsyncpa [#allocation4], 0  ;;  %s338_s12 = smov [#allocation2]   ;;  %s339_s14 = smov [#allocation5]  }
   0x3   :  { %s17_s13 = sshll.u32 %s338_s12, 4  ;;  %s26_s15 = sshll.u32 %s339_s14, 4  ;;  %s18_s13 = int_to_ptr.vmem [resolvable:$true] %s17_s13  ;;  %s366_s15 = int_to_ptr.vmem [resolvable:$true] %s26_s15 }
   0x4   :  { %s266_s18 = scalar_lea.hbm %s412_s0, 128 }
   0x5   :  { %p267_p0 = scmp.ne.s32.totalorder %s412_s0, %s266_s18  ;;  %p270_p1 = scmp.lt.u32.totalorder %s266_s18, %s412_s0 }
   0x7   :  { %p272_p2 = pnand %p270_p1, %p267_p0 }
   0x9   :  { %275 = shalt.err (!%p272_p2)
}
   0xa   :  { %s276_s23 = scalar_lea.vmem %s18_s13, 128  ;;  %p281_p4 = scmp.lt.s32.totalorder %s18_s13, %s18_s13 }
   0xb   :  { %p277_p3 = scmp.ne.s32.totalorder %s18_s13, %s276_s23  ;;  %p282_p5 = scmp.lt.s32.totalorder %s276_s23, %s276_s23 }
   0xd   :  { %p283_p6 = por %p282_p5, %p281_p4 }
   0xf   :  { %p284_p7 = pnand %p283_p6, %p277_p3 }
  0x11   :  { %287 = shalt.err (!%p284_p7)
}
  0x12   :  { %20 = dma.hbm_to_vmem [thread:$0]  %s412_s0, 128, %s18_s13, [#allocation3]  }
  0x13   :  { %s288_s28 = scalar_lea.hbm %s413_s1, 2048 }
  0x14   :  { %p289_p8 = scmp.ne.s32.totalorder %s413_s1, %s288_s28  ;;  %p292_p9 = scmp.lt.u32.totalorder %s288_s28, %s413_s1 }
  0x16   :  { %p294_p10 = pnand %p292_p9, %p289_p8 }
  0x18   :  { %297 = shalt.err (!%p294_p10)
}
  0x19   :  { %s298_s6 = scalar_lea.vmem %s366_s15, 2048  ;;  %p303_p12 = scmp.lt.s32.totalorder %s366_s15, %s366_s15 }
  0x1a   :  { %p299_p11 = scmp.ne.s32.totalorder %s366_s15, %s298_s6  ;;  %p304_p13 = scmp.lt.s32.totalorder %s298_s6, %s298_s6 }
  0x1c   :  { %p305_p0 = por %p304_p13, %p303_p12 }
  0x1e   :  { %p306_p1 = pnand %p305_p0, %p299_p11 }
  0x20   :  { %309 = shalt.err (!%p306_p1)
}
  0x21   :  { %s340_s0 = smov 128   ;;  %s341_s7 = smov 8  }
  0x22   :  { %32 = dma.hbm_to_vmem [thread:$0]  %s413_s1, 2048, %s366_s15, [#allocation6], %s340_s0, %s340_s0, %s341_s7  }
  0x23   :  { %332 = dma.done.wait [#allocation3], 128  }
  0x24   :  { %333 = vsyncadd [#allocation3], 4294967168 }
  0x25   :  { %334 = dma.done.wait [#allocation6], 2048  }
  0x26   :  { %335 = vsyncadd [#allocation6], 4294965248  ;;  %v342_v0 = vmov 0.0|0.0   ;;  %vm343_vm0 = vmmov 0   ;;  %v344_v1 = vmov 0.0   ;;  %v41_v2 = vld [vmem:[#allocation5] sm:$0xff]  ;;  %v144_v34 = vlaneseq }
  0x27   :  { %232 = vmatprep.subr.bf16.mxu0 %v342_v0  ;;  %229 = vmatprep.mubr.msk.f32.mxu0 %vm343_vm0, %v344_v1  ;;  %v42_v3 = vld [vmem:[#allocation5 + $0x8] sm:$0xff]  ;;  %v43_v5 = vld [vmem:[#allocation5 + $0x10] sm:$0xff]  ;;  %v44_v6 = vld [vmem:[#allocation5 + $0x18] sm:$0xff]  ;;  %s345_s11 = smov [#allocation7]  }
  0x28   :  { %v233_v4 = vpack.c.bf16 %v42_v3, %v41_v2  ;;  %v236_v7 = vpack.c.bf16 %v44_v6, %v43_v5  ;;  %v45_v8 = vld [vmem:[#allocation5 + $0x20] sm:$0xff]  ;;  %v46_v9 = vld [vmem:[#allocation5 + $0x28] sm:$0xff]  ;;  %v47_v11 = vld [vmem:[#allocation5 + $0x30] sm:$0xff]  ;;  %v145_v37 = vshrl.u32 %v144_v34, 7 }
  0x29   :  { %v239_v10 = vpack.c.bf16 %v46_v9, %v45_v8  ;;  %v48_v12 = vld [vmem:[#allocation5 + $0x38] sm:$0xff]  ;;  %v49_v14 = vld [vmem:[#allocation5 + $0x40] sm:$0xff]  ;;  %v50_v15 = vld [vmem:[#allocation5 + $0x48] sm:$0xff] }
  0x2a   :  { %234 = vmatpush3.bf16.xpose.msra.mxu0 %v233_v4  ;;  %v242_v13 = vpack.c.bf16 %v48_v12, %v47_v11  ;;  %v245_v16 = vpack.c.bf16 %v50_v15, %v49_v14  ;;  %v51_v17 = vld [vmem:[#allocation5 + $0x50] sm:$0xff]  ;;  %v52_v18 = vld [vmem:[#allocation5 + $0x58] sm:$0xff]  ;;  %v53_v20 = vld [vmem:[#allocation5 + $0x60] sm:$0xff]  ;;  %v148_v39 = vsub.s32 0, %v145_v37 }
  0x2b   :  { %235 = vmatprep.subr.bf16.mxu0 %v342_v0  ;;  %v248_v19 = vpack.c.bf16 %v52_v18, %v51_v17  ;;  %v54_v21 = vld [vmem:[#allocation5 + $0x68] sm:$0xff]  ;;  %v55_v23 = vld [vmem:[#allocation5 + $0x70] sm:$0xff]  ;;  %v56_v24 = vld [vmem:[#allocation5 + $0x78] sm:$0xff] }
  0x2c   :  { %v251_v22 = vpack.c.bf16 %v54_v21, %v53_v20  ;;  %v254_v25 = vpack.c.bf16 %v56_v24, %v55_v23  ;;  %v57_v26 = vld [vmem:[#allocation2] sm:$0xff] }
  0x2d   :  { %v143_v40 = vld [vmem:[%s414_s2] sm:$0x1]  ;;  %s170_s2 = sshll.u32 %s345_s11, 4  ;;  %s171_s2 = int_to_ptr.vmem [resolvable:$true] %s170_s2 }
  0x2e   :  { %v149_v41 = vrot.slane %v143_v40, %v148_v39  ;;  %vm158_vm2 = vcmp.ge.s32.totalorder %v143_v40, 0  ;;  %s310_s12 = scalar_lea.vmem %s171_s2, 16  ;;  %s314_s13 = scalar_lea.vmem %s171_s2, 32 }
  0x2f   :  { %p311_p2 = scmp.ne.s32.totalorder %s171_s2, %s310_s12  ;;  %p315_p3 = scmp.lt.s32.totalorder %s171_s2, %s171_s2 }
  0x30   :  { %vm150_vm1 = vcmp.eq.s32.totalorder %v145_v37, %v149_v41  ;;  %p316_p4 = scmp.lt.s32.totalorder %s314_s13, %s310_s12 }
  0x32   :  { %237 = vmatpush3.bf16.xpose.msra.mxu0 %v236_v7  ;;  %p317_p5 = por %p316_p4, %p315_p3 }
  0x33   :  { %238 = vmatprep.subr.bf16.mxu0 %v342_v0 }
  0x34   :  { %p318_p6 = pnand %p317_p5, %p311_p2 }
  0x3a   :  { %240 = vmatpush3.bf16.xpose.msra.mxu0 %v239_v10 }
  0x3b   :  { %241 = vmatprep.subr.bf16.mxu0 %v342_v0 }
  0x42   :  { %243 = vmatpush3.bf16.xpose.msra.mxu0 %v242_v13 }
  0x43   :  { %244 = vmatprep.subr.bf16.mxu0 %v342_v0 }
  0x4a   :  { %246 = vmatpush3.bf16.xpose.msra.mxu0 %v245_v16 }
  0x4b   :  { %247 = vmatprep.subr.bf16.mxu0 %v342_v0 }
  0x52   :  { %249 = vmatpush3.bf16.xpose.msra.mxu0 %v248_v19 }
  0x53   :  { %250 = vmatprep.subr.bf16.mxu0 %v342_v0 }
  0x5a   :  { %252 = vmatpush3.bf16.xpose.msra.mxu0 %v251_v22 }
  0x5b   :  { %253 = vmatprep.subr.bf16.mxu0 %v342_v0 }
  0x62   :  { %255 = vmatpush3.bf16.xpose.msra.mxu0 %v254_v25 }
  0x69   :  { %230 = vmatmul.mubr.f32.vlgmr.msra.gmra.mrb[0].mxu0 %v57_v26 }
 0x13c   :  { %v124_v27 = vpop.f32.mrb[0].mxu0 }
 0x13d   :  { %v128_v28 = vrot.slane %v124_v27, 4  ;;  %v231_v29 = vpop.f32.mrb[1].mxu0 }
 0x13f   :  { %v129_v30 = vmax.f32 %v124_v27, %v128_v28 }
 0x141   :  { %v130_v31 = vrot.slane %v129_v30, 2 }
 0x143   :  { %v131_v32 = vmax.f32 %v129_v30, %v130_v31 }
 0x145   :  { %v132_v33 = vrot.slane %v131_v32, 1 }
 0x147   :  { %v133_v35 = vmax.f32 %v131_v32, %v132_v33 }
 0x149   :  { %v134_v36 = vsub.f32 %v124_v27, %v133_v35 }
 0x14b   :  { %v135_v38 = vmul.f32 1.442695, %v134_v36 }
 0x14d   :  { %264 = vpow2.f32 %v135_v38 }
 0x157   :  { %v265_v42 = vpop.eup %264 }
 0x158   :  { %v137_v43 = vrot.slane %v265_v42, 4  ;;  %v151_v44 = vsel %vm150_vm1, %v265_v42, 0.0 }
 0x159   :  { %v152_v45 = vrot.slane %v151_v44, 4 }
 0x15a   :  { %v138_v46 = vadd.f32 %v265_v42, %v137_v43 }
 0x15b   :  { %v153_v47 = vadd.f32 %v152_v45, %v151_v44 }
 0x15c   :  { %v139_v48 = vrot.slane %v138_v46, 2 }
 0x15d   :  { %v154_v49 = vrot.slane %v153_v47, 2 }
 0x15e   :  { %v140_v50 = vadd.f32 %v139_v48, %v138_v46 }
 0x15f   :  { %v155_v51 = vadd.f32 %v154_v49, %v153_v47 }
 0x160   :  { %v141_v52 = vrot.slane %v140_v50, 1 }
 0x161   :  { %v156_v53 = vrot.slane %v155_v51, 1 }
 0x162   :  { %v142_v54 = vadd.f32 %v141_v52, %v140_v50 }
 0x163   :  { %v157_v55 = vadd.f32 %v156_v53, %v155_v51 }
 0x164   :  { %v159_v56 = vmul.f32 0.5, %v142_v54 }
 0x166   :  { %vm160_vm3 = vcmp.gt.f32.partialorder %v157_v55, %v159_v56 }
 0x167   :  { %vm161_vm4 = vmand %vm158_vm2, %vm160_vm3 }
 0x168   :  { %v162_v57 = vsel %vm161_vm4, %v143_v40, 4294967295 }
 0x169   :  { %163 = vst [vmem:[#allocation7] sm:$0x1] %v162_v57 }
 0x16a   :  { %321 = shalt.err (!%p318_p6)
}
 0x16b   :  { %s322_s16 = scalar_lea.hbm %s415_s3, 16 }
 0x16c   :  { %p323_p7 = scmp.ne.s32.totalorder %s415_s3, %s322_s16  ;;  %p326_p8 = scmp.lt.u32.totalorder %s322_s16, %s415_s3 }
 0x16e   :  { %p328_p9 = pnand %p326_p8, %p323_p7 }
 0x170   :  { %331 = shalt.err (!%p328_p9)
}
 0x171   :  { %173 = dma.vmem_to_hbm [thread:$0]  %s171_s2, 16, %s415_s3, [#allocation4]  }
 0x172   :  { %336 = dma.done.wait [#allocation4], 16  }
 0x173   :  { %337 = vsyncadd [#allocation4], 4294967280 }
 0x174   :  { %177 = vsyncpa [#allocation3], 1 }
 0x175   :  { %178 = vsyncpa [#allocation6], 1 }
 0x176   :  { %179 = vsyncpa [#allocation4], 1 }

</bundles_post_ra>
